<compile_context>
chip_gen: v5e
topology: v5e:2x2
jax: 0.10.0
libtpu: 0.0.40
codegen_flags: <defaults>
</compile_context>

<pallas_src>
import functools

import jax
import jax.numpy as jnp
from jax import lax
from jax.experimental import pallas as pl
from jax.experimental.pallas import tpu as pltpu


def _mha_kernel(q_ref, k_ref, v_ref, wq_ref, wk_ref, wv_ref, o_ref, *,
                num_heads: int, causal: bool):
    TQ, E_in = q_ref.shape
    S_kv = k_ref.shape[0]
    HE = wq_ref.shape[1]
    H = num_heads
    E = HE // H
    f32 = jnp.float32
    bf16 = jnp.bfloat16

    # (1) Flattened lane-dense projections: one (tq, E_in) @ (E_in, H*E) MXU
    #     matmul per tensor; bf16 operands, f32 accumulation.
    proj_dn = (((1,), (0,)), ((), ()))
    q_flat = lax.dot_general(q_ref[...].astype(bf16), wq_ref[...], proj_dn,
                             preferred_element_type=f32)          # (TQ, H*E)
    k_flat = lax.dot_general(k_ref[...].astype(bf16), wk_ref[...], proj_dn,
                             preferred_element_type=f32)          # (S,  H*E)
    v_flat = lax.dot_general(v_ref[...].astype(bf16), wv_ref[...], proj_dn,
                             preferred_element_type=f32)          # (S,  H*E)

    # (2) Head-major (H, ·, E): stack static per-head lane slices along a new
    #     leading batch axis so every batched matmul below has batch at axis 0
    #     and contracts the natural lane axes (no mid-axis batch relayouts).
    def to_head_major(x_flat):
        return jnp.stack([x_flat[:, h * E:(h + 1) * E] for h in range(H)],
                         axis=0)

    inv_sqrt_d = f32(1.0 / float(E) ** 0.5)
    q = to_head_major(q_flat) * inv_sqrt_d                        # (H, TQ, E)
    k = to_head_major(k_flat)                                     # (H, S,  E)
    v = to_head_major(v_flat)                                     # (H, S,  E)

    # (3) Scores 'hqd,hkd->hqk': batch axis 0, bf16 MXU operands, f32 accum.
    score_dn = (((2,), (2,)), ((0,), (0,)))
    scores = lax.dot_general(q.astype(bf16), k.astype(bf16), score_dn,
                             preferred_element_type=f32)          # (H, TQ, S)

    # (4) Causal mask generated in-kernel (no S^2 bias tensor over HBM).
    #     Additive -1e30 in f32 keeps masking exact with bf16 MXU operands and
    #     never produces inf-inf NaNs; causal rows always keep the diagonal so
    #     no fully-masked rows arise.
    # TODO(synk): arbitrary padding masks would be fed as scalar-prefetched
    # per-row lengths rather than an (S,S) bias tensor.
    if causal:
        q_pos = (pl.program_id(0) * TQ
                 + lax.broadcasted_iota(jnp.int32, (TQ, S_kv), 0))
        k_pos = lax.broadcasted_iota(jnp.int32, (TQ, S_kv), 1)
        bias = jnp.where(k_pos > q_pos, f32(-1e30), f32(0.0))
        scores = scores + bias[None, :, :]

    # (5) Numerically-stable softmax in f32; normalization via the approximate
    #     EUP reciprocal (off the VALU slots) + multiply.
    m = jnp.max(scores, axis=-1, keepdims=True)
    p = jnp.exp(scores - m)
    l = jnp.sum(p, axis=-1, keepdims=True)
    attn = p * pl.reciprocal(l, approx=True)

    # (6) PV 'hqk,hkd->hqd': batch axis 0, bf16 operands, f32 accumulation.
    pv_dn = (((2,), (1,)), ((0,), (0,)))
    out = lax.dot_general(attn.astype(bf16), v.astype(bf16), pv_dn,
                          preferred_element_type=f32)             # (H, TQ, E)

    # (7) Assemble the torch.cat(dim=1) slab and write it with ONE lane-dense
    #     store (no per-head narrow column-slice stores).
    slab = jnp.concatenate([out[h] for h in range(H)], axis=-1)    # (TQ, H*E)
    o_ref[...] = slab.astype(o_ref.dtype)


@functools.partial(jax.jit, static_argnames=("causal",))
def multi_head_attention(q_enc, k_enc, v_enc, wq, wk, wv, *, causal=False):
    """Pallas-TPU forward of the PyTorch MultiHeadAttention module.

    q_enc/k_enc/v_enc : (S, E) f32 encodings.
    wq/wk/wv          : (H, E, E) f32 per-head bias-free nn.Linear weights in
                        PyTorch (out_features, in_features) layout.
    causal            : apply the demo's causal mask (mask = ~tril), generated
                        in-kernel (no (S,S) bias tensor is shipped).
    Returns (S, H*E) f32 == torch.cat([head_h(q, k, v, mask) for h], dim=1).
    """
    S, E_in = q_enc.shape
    H, E_out, _ = wq.shape
    HE = H * E_out

    # Wrapper-side layout plumbing (handled by XLA, outside the kernel):
    # (H, E_out, E_in) -> (E_in, H*E_out) with columns grouped per head, so
    # the in-kernel projection is a single lane-dense matmul whose result is
    # already in the concatenated output layout. Pre-cast to bf16 (MXU-only
    # operand) to halve its HBM/VMEM traffic.
    def flatten_w(w):
        return jnp.transpose(w, (2, 0, 1)).reshape(E_in, HE).astype(jnp.bfloat16)

    wq_f, wk_f, wv_f = flatten_w(wq), flatten_w(wk), flatten_w(wv)

    # Grid over q-row blocks ("parallel" => shards across TensorCores on
    # v7x megacore); K/V and the flattened weights stay resident per step.
    block_q = S if S <= 128 else 128
    assert S % block_q == 0, "demo wrapper assumes S divisible by the q block"
    grid = (S // block_q,)

    kernel = functools.partial(_mha_kernel, num_heads=H, causal=causal)

    return pl.pallas_call(
        kernel,
        grid=grid,
        in_specs=[
            pl.BlockSpec((block_q, E_in), lambda i: (i, 0)),   # q block
            pl.BlockSpec((S, E_in), lambda i: (0, 0)),         # K (resident)
            pl.BlockSpec((S, E_in), lambda i: (0, 0)),         # V (resident)
            pl.BlockSpec((E_in, HE), lambda i: (0, 0)),        # Wq flat bf16
            pl.BlockSpec((E_in, HE), lambda i: (0, 0)),        # Wk flat bf16
            pl.BlockSpec((E_in, HE), lambda i: (0, 0)),        # Wv flat bf16
        ],
        out_specs=pl.BlockSpec((block_q, HE), lambda i: (i, 0)),
        out_shape=jax.ShapeDtypeStruct((S, HE), jnp.float32),
        compiler_params=pltpu.CompilerParams(
            dimension_semantics=("parallel",)),
    )(q_enc, k_enc, v_enc, wq_f, wk_f, wv_f)


def _reference(q_enc, k_enc, v_enc, wq, wk, wv, causal):
    """Pure-f32 JAX port of the PyTorch module (per-head loop + cat)."""
    S = q_enc.shape[0]
    mask = None
    if causal:
        mask = jnp.arange(S)[None, :] > jnp.arange(S)[:, None]
    outs = []
    for h in range(wq.shape[0]):
        q = q_enc @ wq[h].T
        k = k_enc @ wk[h].T
        v = v_enc @ wv[h].T
        s = (q @ k.T) / jnp.sqrt(jnp.float32(k.shape[1]))
        if mask is not None:
            s = jnp.where(mask, -jnp.inf, s)
        outs.append(jax.nn.softmax(s, axis=-1) @ v)
    return jnp.concatenate(outs, axis=1)


if __name__ == "__main__":
    SEQ, EMBED, NUM_HEADS = 8, 8, 2

    key = jax.random.PRNGKey(0)
    kq, kk, kv, kwq, kwk, kwv = jax.random.split(key, 6)

    q_encodings = jax.random.normal(kq, (SEQ, EMBED), dtype=jnp.float32)
    k_encodings = jax.random.normal(kk, (SEQ, EMBED), dtype=jnp.float32)
    v_encodings = jax.random.normal(kv, (SEQ, EMBED), dtype=jnp.float32)

    # Deterministic per-head Linear weights, PyTorch (out, in) layout.
    scale = 1.0 / float(EMBED) ** 0.5
    wq = jax.random.uniform(kwq, (NUM_HEADS, EMBED, EMBED), jnp.float32, -scale, scale)
    wk = jax.random.uniform(kwk, (NUM_HEADS, EMBED, EMBED), jnp.float32, -scale, scale)
    wv = jax.random.uniform(kwv, (NUM_HEADS, EMBED, EMBED), jnp.float32, -scale, scale)

    # Causal demo (matches `mask = ~mask` + masked_fill(-inf) in the script).
    out_causal = jax.block_until_ready(
        multi_head_attention(q_encodings, k_encodings, v_encodings,
                             wq, wk, wv, causal=True))
    ref_causal = _reference(q_encodings, k_encodings, v_encodings,
                            wq, wk, wv, causal=True)

    # Unmasked path (mask=None in the module).
    out_plain = jax.block_until_ready(
        multi_head_attention(q_encodings, k_encodings, v_encodings,
                             wq, wk, wv, causal=False))
    ref_plain = _reference(q_encodings, k_encodings, v_encodings,
                           wq, wk, wv, causal=False)

    assert out_causal.shape == (SEQ, NUM_HEADS * EMBED)
    assert out_plain.shape == (SEQ, NUM_HEADS * EMBED)
    # Tolerance reflects bf16 MXU operands (f32 accumulation) + approx
    # reciprocal, compared against a pure-f32 reference.
    assert jnp.allclose(out_causal, ref_causal, atol=5e-2, rtol=5e-2), \
        float(jnp.max(jnp.abs(out_causal - ref_causal)))
    assert jnp.allclose(out_plain, ref_plain, atol=5e-2, rtol=5e-2), \
        float(jnp.max(jnp.abs(out_plain - ref_plain)))

    print("KERNEL_OK")
</pallas_src>

<mosaic_0001>
module attributes {stable_mosaic.version = 11 : i64} {
  func.func @_mha_kernel(%arg0: i32, %arg1: memref<8x8xf32, #tpu.memory_space<vmem>>, %arg2: memref<8x8xf32, #tpu.memory_space<vmem>>, %arg3: memref<8x8xf32, #tpu.memory_space<vmem>>, %arg4: memref<8x16xbf16, #tpu.memory_space<vmem>>, %arg5: memref<8x16xbf16, #tpu.memory_space<vmem>>, %arg6: memref<8x16xbf16, #tpu.memory_space<vmem>>, %arg7: memref<8x16xf32, #tpu.memory_space<vmem>>) attributes {dimension_semantics = [#tpu.dimension_semantics<parallel>], iteration_bounds = array<i64: 1>, scalar_prefetch = 0 : i64, scratch_operands = 0 : i64, tpu.core_type = #tpu.core_type<tc>, window_params = [{transform_indices = @transform_0, window_bounds = array<i64: 8, 8>}, {pipeline_mode = #tpu.pipeline_mode<synchronous>, transform_indices = @transform_1, window_bounds = array<i64: 8, 8>}, {pipeline_mode = #tpu.pipeline_mode<synchronous>, transform_indices = @transform_2, window_bounds = array<i64: 8, 8>}, {pipeline_mode = #tpu.pipeline_mode<synchronous>, transform_indices = @transform_3, window_bounds = array<i64: 8, 16>}, {pipeline_mode = #tpu.pipeline_mode<synchronous>, transform_indices = @transform_4, window_bounds = array<i64: 8, 16>}, {pipeline_mode = #tpu.pipeline_mode<synchronous>, transform_indices = @transform_5, window_bounds = array<i64: 8, 16>}, {transform_indices = @transform_6, window_bounds = array<i64: 8, 16>}]} {
    %c0 = arith.constant 0 : index
    %c0_0 = arith.constant 0 : index
    %0 = vector.load %arg1[%c0, %c0_0] : memref<8x8xf32, #tpu.memory_space<vmem>>, vector<8x8xf32>
    %1 = arith.truncf %0 : vector<8x8xf32> to vector<8x8xbf16>
    %c0_1 = arith.constant 0 : index
    %c0_2 = arith.constant 0 : index
    %2 = vector.load %arg4[%c0_1, %c0_2] : memref<8x16xbf16, #tpu.memory_space<vmem>>, vector<8x16xbf16>
    %cst = arith.constant dense<0.000000e+00> : vector<8x16xf32>
    %3 = tpu.matmul %1, %2, %cst {dimension_numbers = #tpu.dot_dimension_numbers<[1], [0], [0], [1], [0, 0, 1, 1], [], []>} : vector<8x8xbf16>, vector<8x16xbf16>, vector<8x16xf32> -> vector<8x16xf32>
    %c0_3 = arith.constant 0 : index
    %c0_4 = arith.constant 0 : index
    %4 = vector.load %arg2[%c0_3, %c0_4] : memref<8x8xf32, #tpu.memory_space<vmem>>, vector<8x8xf32>
    %5 = arith.truncf %4 : vector<8x8xf32> to vector<8x8xbf16>
    %c0_5 = arith.constant 0 : index
    %c0_6 = arith.constant 0 : index
    %6 = vector.load %arg5[%c0_5, %c0_6] : memref<8x16xbf16, #tpu.memory_space<vmem>>, vector<8x16xbf16>
    %cst_7 = arith.constant dense<0.000000e+00> : vector<8x16xf32>
    %7 = tpu.matmul %5, %6, %cst_7 {dimension_numbers = #tpu.dot_dimension_numbers<[1], [0], [0], [1], [0, 0, 1, 1], [], []>} : vector<8x8xbf16>, vector<8x16xbf16>, vector<8x16xf32> -> vector<8x16xf32>
    %c0_8 = arith.constant 0 : index
    %c0_9 = arith.constant 0 : index
    %8 = vector.load %arg3[%c0_8, %c0_9] : memref<8x8xf32, #tpu.memory_space<vmem>>, vector<8x8xf32>
    %9 = arith.truncf %8 : vector<8x8xf32> to vector<8x8xbf16>
    %c0_10 = arith.constant 0 : index
    %c0_11 = arith.constant 0 : index
    %10 = vector.load %arg6[%c0_10, %c0_11] : memref<8x16xbf16, #tpu.memory_space<vmem>>, vector<8x16xbf16>
    %cst_12 = arith.constant dense<0.000000e+00> : vector<8x16xf32>
    %11 = tpu.matmul %9, %10, %cst_12 {dimension_numbers = #tpu.dot_dimension_numbers<[1], [0], [0], [1], [0, 0, 1, 1], [], []>} : vector<8x8xbf16>, vector<8x16xbf16>, vector<8x16xf32> -> vector<8x16xf32>
    %12 = vector.extract_strided_slice %3 {offsets = [0, 0], sizes = [8, 8], strides = [1, 1]} : vector<8x16xf32> to vector<8x8xf32>
    %13 = vector.extract_strided_slice %3 {offsets = [0, 8], sizes = [8, 8], strides = [1, 1]} : vector<8x16xf32> to vector<8x8xf32>
    %14 = vector.shape_cast %12 : vector<8x8xf32> to vector<1x8x8xf32>
    %15 = vector.shape_cast %13 : vector<8x8xf32> to vector<1x8x8xf32>
    %16 = tpu.concatenate %14, %15 in 0 : vector<1x8x8xf32>, vector<1x8x8xf32> -> vector<2x8x8xf32>
    %cst_13 = arith.constant 0.353553385 : f32
    %17 = vector.broadcast %cst_13 : f32 to vector<2x8x8xf32>
    %18 = arith.mulf %16, %17 : vector<2x8x8xf32>
    %19 = vector.extract_strided_slice %7 {offsets = [0, 0], sizes = [8, 8], strides = [1, 1]} : vector<8x16xf32> to vector<8x8xf32>
    %20 = vector.extract_strided_slice %7 {offsets = [0, 8], sizes = [8, 8], strides = [1, 1]} : vector<8x16xf32> to vector<8x8xf32>
    %21 = vector.shape_cast %19 : vector<8x8xf32> to vector<1x8x8xf32>
    %22 = vector.shape_cast %20 : vector<8x8xf32> to vector<1x8x8xf32>
    %23 = tpu.concatenate %21, %22 in 0 : vector<1x8x8xf32>, vector<1x8x8xf32> -> vector<2x8x8xf32>
    %24 = vector.extract_strided_slice %11 {offsets = [0, 0], sizes = [8, 8], strides = [1, 1]} : vector<8x16xf32> to vector<8x8xf32>
    %25 = vector.extract_strided_slice %11 {offsets = [0, 8], sizes = [8, 8], strides = [1, 1]} : vector<8x16xf32> to vector<8x8xf32>
    %26 = vector.shape_cast %24 : vector<8x8xf32> to vector<1x8x8xf32>
    %27 = vector.shape_cast %25 : vector<8x8xf32> to vector<1x8x8xf32>
    %28 = tpu.concatenate %26, %27 in 0 : vector<1x8x8xf32>, vector<1x8x8xf32> -> vector<2x8x8xf32>
    %29 = arith.truncf %18 : vector<2x8x8xf32> to vector<2x8x8xbf16>
    %30 = arith.truncf %23 : vector<2x8x8xf32> to vector<2x8x8xbf16>
    %cst_14 = arith.constant dense<0.000000e+00> : vector<2x8x8xf32>
    %31 = tpu.matmul %29, %30, %cst_14 {dimension_numbers = #tpu.dot_dimension_numbers<[2], [2], [1], [1], [0, 0, 0, 1, 1, 1], [0], [0]>} : vector<2x8x8xbf16>, vector<2x8x8xbf16>, vector<2x8x8xf32> -> vector<2x8x8xf32>
    %c8_i32 = arith.constant 8 : i32
    %32 = arith.muli %arg0, %c8_i32 : i32
    %33 = tpu.iota {dimensions = array<i32: 0>} : vector<8x8xi32>
    %34 = vector.broadcast %32 : i32 to vector<8x8xi32>
    %35 = arith.addi %34, %33 : vector<8x8xi32>
    %36 = tpu.iota {dimensions = array<i32: 1>} : vector<8x8xi32>
    %37 = arith.cmpi sgt, %36, %35 : vector<8x8xi32>
    %cst_15 = arith.constant -1.000000e+30 : f32
    %cst_16 = arith.constant 0.000000e+00 : f32
    %38 = vector.broadcast %cst_15 : f32 to vector<8x8xf32>
    %39 = vector.broadcast %cst_16 : f32 to vector<8x8xf32>
    %40 = arith.select %37, %38, %39 : vector<8x8xi1>, vector<8x8xf32>
    %41 = vector.shape_cast %40 : vector<8x8xf32> to vector<1x8x8xf32>
    %42 = vector.broadcast %41 : vector<1x8x8xf32> to vector<2x8x8xf32>
    %43 = arith.addf %31, %42 : vector<2x8x8xf32>
    %cst_17 = arith.constant dense<0xFF800000> : vector<2x8xf32>
    %44 = vector.multi_reduction <maximumf>, %43, %cst_17 [2] : vector<2x8x8xf32> to vector<2x8xf32>
    %45 = vector.shape_cast %44 : vector<2x8xf32> to vector<2x8x1xf32>
    %46 = vector.broadcast %45 : vector<2x8x1xf32> to vector<2x8x8xf32>
    %47 = arith.subf %43, %46 : vector<2x8x8xf32>
    %48 = math.exp %47 : vector<2x8x8xf32>
    %cst_18 = arith.constant dense<0.000000e+00> : vector<2x8xf32>
    %49 = vector.multi_reduction <add>, %48, %cst_18 [2] : vector<2x8x8xf32> to vector<2x8xf32>
    %50 = vector.shape_cast %49 : vector<2x8xf32> to vector<2x8x1xf32>
    %51 = tpu.reciprocal %50 {approx = true} : vector<2x8x1xf32> -> vector<2x8x1xf32>
    %52 = vector.broadcast %51 : vector<2x8x1xf32> to vector<2x8x8xf32>
    %53 = arith.mulf %48, %52 : vector<2x8x8xf32>
    %54 = arith.truncf %53 : vector<2x8x8xf32> to vector<2x8x8xbf16>
    %55 = arith.truncf %28 : vector<2x8x8xf32> to vector<2x8x8xbf16>
    %cst_19 = arith.constant dense<0.000000e+00> : vector<2x8x8xf32>
    %56 = tpu.matmul %54, %55, %cst_19 {dimension_numbers = #tpu.dot_dimension_numbers<[2], [1], [1], [2], [0, 0, 0, 1, 1, 2], [0], [0]>} : vector<2x8x8xbf16>, vector<2x8x8xbf16>, vector<2x8x8xf32> -> vector<2x8x8xf32>
    %57 = vector.extract_strided_slice %56 {offsets = [0, 0, 0], sizes = [1, 8, 8], strides = [1, 1, 1]} : vector<2x8x8xf32> to vector<1x8x8xf32>
    %58 = vector.shape_cast %57 : vector<1x8x8xf32> to vector<8x8xf32>
    %59 = vector.extract_strided_slice %56 {offsets = [1, 0, 0], sizes = [1, 8, 8], strides = [1, 1, 1]} : vector<2x8x8xf32> to vector<1x8x8xf32>
    %60 = vector.shape_cast %59 : vector<1x8x8xf32> to vector<8x8xf32>
    %61 = tpu.concatenate %58, %60 in 1 : vector<8x8xf32>, vector<8x8xf32> -> vector<8x16xf32>
    %c0_20 = arith.constant 0 : index
    %c0_21 = arith.constant 0 : index
    %62 = vector.load %arg7[%c0_20, %c0_21] : memref<8x16xf32, #tpu.memory_space<vmem>>, vector<8x16xf32>
    tpu.vector_store %arg7[%c0_20, %c0_21], %61 {strides = array<i32>} : memref<8x16xf32, #tpu.memory_space<vmem>>, vector<8x16xf32>,
    return
  }
  func.func @transform_0(%arg0: i32) -> (i32, i32) {
    %c0_i32 = arith.constant 0 : i32
    %c0_i32_0 = arith.constant 0 : i32
    return %arg0, %c0_i32 : i32, i32
  }
  func.func @transform_1(%arg0: i32) -> (i32, i32) {
    %c0_i32 = arith.constant 0 : i32
    %c0_i32_0 = arith.constant 0 : i32
    %c0_i32_1 = arith.constant 0 : i32
    return %c0_i32, %c0_i32_0 : i32, i32
  }
  func.func @transform_2(%arg0: i32) -> (i32, i32) {
    %c0_i32 = arith.constant 0 : i32
    %c0_i32_0 = arith.constant 0 : i32
    %c0_i32_1 = arith.constant 0 : i32
    return %c0_i32, %c0_i32_0 : i32, i32
  }
  func.func @transform_3(%arg0: i32) -> (i32, i32) {
    %c0_i32 = arith.constant 0 : i32
    %c0_i32_0 = arith.constant 0 : i32
    %c0_i32_1 = arith.constant 0 : i32
    return %c0_i32, %c0_i32_0 : i32, i32
  }
  func.func @transform_4(%arg0: i32) -> (i32, i32) {
    %c0_i32 = arith.constant 0 : i32
    %c0_i32_0 = arith.constant 0 : i32
    %c0_i32_1 = arith.constant 0 : i32
    return %c0_i32, %c0_i32_0 : i32, i32
  }
  func.func @transform_5(%arg0: i32) -> (i32, i32) {
    %c0_i32 = arith.constant 0 : i32
    %c0_i32_0 = arith.constant 0 : i32
    %c0_i32_1 = arith.constant 0 : i32
    return %c0_i32, %c0_i32_0 : i32, i32
  }
  func.func @transform_6(%arg0: i32) -> (i32, i32) {
    %c0_i32 = arith.constant 0 : i32
    %c0_i32_0 = arith.constant 0 : i32
    return %arg0, %c0_i32 : i32, i32
  }
}

</mosaic_0001>

<bundles_post_ra>
// kernel: multi_head_attention.1
= control target key start
LH: loop header
LB: loop body
LE: loop exit
PB: predicated region body
PF: predicated region fallthrough
CT: control target
= control target key end

     0   :  { %vm32_vm0 = vcmask 1043456   ;;  %s372_s0 = inlined_call_operand.vmem [shape: f32[8,8], index: 0, kind: input, shape index: {}]   ;;  %s373_s1 = inlined_call_operand.vmem [shape: f32[8,8], index: 1, kind: input, shape index: {}]   ;;  %s374_s2 = inlined_call_operand.vmem [shape: f32[8,8], index: 2, kind: input, shape index: {}]   ;;  %s375_s3 = inlined_call_operand.vmem [shape: bf16[8,16], index: 3, kind: input, shape index: {}]   ;;  %s376_s4 = inlined_call_operand.vmem [shape: bf16[8,16], index: 4, kind: input, shape index: {}]   ;;  %s377_s5 = inlined_call_operand.vmem [shape: bf16[8,16], index: 5, kind: input, shape index: {}]   ;;  %s378_s6 = inlined_call_operand.hbm [shape: f32[8,16], index: 6, kind: output, shape index: {}]  }
   0x1   :  { %v27_v0 = vld [vmem:[%s375_s3] sm:$0xf] }
   0x2   :  { %v51_v1 = vld [vmem:[%s376_s4] sm:$0xf]  ;;  %v34_v3 = vsel %vm32_vm0, %v27_v0, 0 }
   0x3   :  { %v25_v2 = vld [vmem:[%s372_s0] sm:$0xff]  ;;  %v56_v4 = vsel %vm32_vm0, %v51_v1, 0 }
   0x4   :  { %v26_v5 = vpack.c.bf16 %v25_v2, %v25_v2  ;;  %v49_v6 = vld [vmem:[%s373_s1] sm:$0xff] }
   0x5   :  { %11 = vsyncpa [#allocation3], 0  ;;  %43 = vmatpush.bf16.msra.mxu0 %v34_v3  ;;  %65 = vmatpush.bf16.msra.mxu1 %v56_v4  ;;  %vm28_vm1 = vcmask 64512   ;;  %v50_v7 = vpack.c.bf16 %v49_v6, %v49_v6  ;;  %s290_s0 = smov 120   ;;  %v73_v24 = vld [vmem:[%s377_s5] sm:$0xf]  ;;  %v112_v28 = vlaneseq }
   0x6   :  { %v71_v25 = vld [vmem:[%s374_s2] sm:$0xff]  ;;  %v78_v26 = vsel %vm32_vm0, %v73_v24, 0  ;;  %v291_v31 = vmov 0.0   ;;  %s292_s2 = smov 8   ;;  %s293_s5 = smov [#allocation2]   ;;  %vm227_vm3 = vcmask 130048  }
   0x7   :  { %v72_v27 = vpack.c.bf16 %v71_v25, %v71_v25  ;;  %87 = vmatpush.bf16.msra.mxu2 %v78_v26  ;;  %v113_v29 = vshrl.u32 %v112_v28, 7  ;;  %v117_v30 = vand.u32 127, %v112_v28  ;;  %s234_s30 = sshll.u32 %s293_s5, 4  ;;  %s236_s9 = sshll.u32 %s378_s6, 4  ;;  %s235_s30 = int_to_ptr.vmem [resolvable:$true] %s234_s30  ;;  %s237_s9 = int_to_ptr.hbm [resolvable:$true] %s236_s9 }
   0x8   :  { %245 = vmatmul.msk.bf16.vlgmr.msra.gmra.mxu0 %vm28_vm1, %v26_v5  ;;  %246 = vmatmul.msk.bf16.vlgmr.msra.gmra.mxu1 %vm28_vm1, %v50_v7 }
   0x9   :  { %vm118_vm2 = vcmp.gt.s32.totalorder %v117_v30, %v113_v29 }
   0xa   :  { %247 = vmatmul.msk.bf16.vlgmr.msra.gmra.mxu2 %vm28_vm1, %v72_v27  ;;  %v119_v32 = vsel %vm118_vm2, -1e+30, %v291_v31 }
  0x85   :  { %v45_v8 = vpop.f32.mrf.mxu0  ;;  %v67_v9 = vpop.f32.mrf.mxu1 }
  0x86   :  { %100 = vrot.lane.b32.xlu0 %v67_v9, %s290_s0  ;;  %v109_v10 = vpack.c.bf16 %v67_v9, %v67_v9  ;;  %v97_v11 = vmul.f32 0.35355338, %v45_v8 }
  0x88   :  { %v124_v12 = vsel %vm28_vm1, %v109_v10, 0  ;;  %v107_v13 = vpack.c.bf16 %v97_v11, %v97_v11 }
  0x89   :  { %133 = vmatpush.bf16.xpose.msra.mxu3 %v124_v12 }
  0x8d   :  { %v47_v14 = vpop.f32.mrf.mxu0  ;;  %v69_v15 = vpop.f32.mrf.mxu1 }
  0x8e   :  { %94 = vrot.lane.b32.xlu0 %v45_v8, %s290_s0  ;;  %v89_v39 = vpop.f32.mrf.mxu2 }
  0x8f   :  { %v182_v42 = vpack.c.bf16 %v89_v39, %v89_v39 }
  0x90   :  { %248 = vmatmul.msk.bf16.vlgmr.msra.gmra.mxu3 %vm28_vm1, %v107_v13 }
  0x91   :  { %v188_v45 = vsel %vm32_vm0, %v182_v42, 0 }
  0x92   :  { %197 = vmatpush.bf16.msrb.mxu1 %v188_v45 }
  0x96   :  { %v91_v44 = vpop.f32.mrf.mxu2 }
  0xf8   :  { %v101_v16 = vpop.permute.xlu0 %100 }
  0xf9   :  { %v110_v17 = vpack.c.bf16 %v101_v16, %v101_v16 }
  0xfb   :  { %v143_v18 = vsel %vm28_vm1, %v110_v17, 0 }
  0xfc   :  { %152 = vmatpush.bf16.xpose.msrb.mxu0 %v143_v18 }
 0x100   :  { %v95_v19 = vpop.permute.xlu0 %94 }
 0x101   :  { %v98_v20 = vmul.f32 0.35355338, %v95_v19 }
 0x103   :  { %v108_v21 = vpack.c.bf16 %v98_v20, %v98_v20 }
 0x105   :  { %249 = vmatmul.msk.bf16.vlgmr.msrb.gmra.mxu0 %vm28_vm1, %v108_v21 }
 0x113   :  { %v135_v22 = vpop.f32.mrf.mxu3 }
 0x114   :  { %v136_v36 = vadd.f32 %v135_v22, %v119_v32 }
 0x116   :  { %v158_v38 = vsel %vm28_vm1, %v136_v36, -inf }
 0x11b   :  { %v137_v23 = vpop.f32.mrf.mxu3 }
 0x182   :  { %v154_v33 = vpop.f32.mrf.mxu0 }
 0x183   :  { %v155_v34 = vadd.f32 %v154_v33, %v119_v32 }
 0x185   :  { %v161_v35 = vsel %vm28_vm1, %v155_v34, -inf }
 0x186   :  { %162 = vmax.xlane.f32.xlu1 %v161_v35 }
 0x18a   :  { %v156_v37 = vpop.f32.mrf.mxu0 }
 0x18e   :  { %159 = vmax.xlane.f32.xlu1 %v158_v38 }
 0x1f9   :  { %v163_v40 = vpop.xlane.xlu1 %162 }
 0x1fa   :  { %v165_v41 = vsub.f32 %v155_v34, %v163_v40 }
 0x1fc   :  { %v168_v43 = vmul.f32 1.442695, %v165_v41 }
 0x1fe   :  { %256 = vpow2.f32 %v168_v43 }
 0x201   :  { %v160_v46 = vpop.xlane.xlu1 %159 }
 0x202   :  { %v164_v47 = vsub.f32 %v136_v36, %v160_v46 }
 0x204   :  { %v257_v48 = vpop.eup %256  ;;  %v166_v49 = vmul.f32 1.442695, %v164_v47 }
 0x205   :  { %v173_v50 = vsel %vm28_vm1, %v257_v48, 0.0 }
 0x206   :  { %258 = vpow2.f32 %v166_v49  ;;  %174 = vadd.xlane.f32.xlu2 %v173_v50 }
 0x20c   :  { %v259_v51 = vpop.eup %258 }
 0x20d   :  { %v170_v52 = vsel %vm28_vm1, %v259_v51, 0.0 }
 0x20e   :  { %171 = vadd.xlane.f32.xlu0 %v170_v52 }
 0x21e   :  { %104 = vrot.lane.b32.xlu2 %v89_v39, %s290_s0 }
 0x279   :  { %v175_v53 = vpop.xlane.xlu2 %174 }
 0x27a   :  { %260 = vrcp.f32 %v175_v53 }
 0x280   :  { %v261_v54 = vpop.eup %260 }
 0x281   :  { %v105_v55 = vpop.permute.xlu2 %104  ;;  %v172_v56 = vpop.xlane.xlu0 %171  ;;  %v179_v57 = vmul.f32 %v261_v54, %v257_v48 }
 0x282   :  { %v183_v58 = vpack.c.bf16 %v105_v55, %v105_v55  ;;  %262 = vrcp.f32 %v172_v56 }
 0x283   :  { %v181_v60 = vpack.c.bf16 %v179_v57, %v179_v57 }
 0x284   :  { %v207_v59 = vsel %vm32_vm0, %v183_v58, 0 }
 0x285   :  { %216 = vmatpush.bf16.msrb.mxu2 %v207_v59 }
 0x288   :  { %v263_v61 = vpop.eup %262  ;;  %251 = vmatmul.msk.bf16.vlgmr.msrb.gmra.mxu2 %vm28_vm1, %v181_v60 }
 0x289   :  { %v178_v62 = vmul.f32 %v263_v61, %v259_v51 }
 0x28b   :  { %v180_v63 = vpack.c.bf16 %v178_v62, %v178_v62 }
 0x28d   :  { %250 = vmatmul.msk.bf16.vlgmr.msrb.gmra.mxu1 %vm28_vm1, %v180_v63 }
 0x30a   :  { %v199_v0 = vpop.f32.mrf.mxu1 }
 0x30b   :  { %v218_v1 = vpop.f32.mrf.mxu2 }
 0x30c   :  { %223 = vrot.lane.b32.xlu1 %v218_v1, %s292_s2 }
 0x312   :  { %v201_v2 = vpop.f32.mrf.mxu1 }
 0x313   :  { %v220_v3 = vpop.f32.mrf.mxu2 }
 0x37e   :  { %v224_v4 = vpop.permute.xlu1 %223 }
 0x37f   :  { %v226_v5 = vsel %vm28_vm1, %v199_v0, %v224_v4 }
 0x380   :  { %228 = vst.msk [vmem:[#allocation2] sm:$0xff] %vm227_vm3, %v226_v5 }
 0x381   :  { %239 = dma.vmem_to_hbm [thread:$0]  %s235_s30, 128, %s237_s9, [#allocation3]  }
 0x382   :  { %288 = dma.done.wait [#allocation3], 128  }
 0x383   :  { %289 = vsyncadd [#allocation3], 4294967168 }
 0x384   :  { %244 = vsyncpa [#allocation3], 1 }

</bundles_post_ra>
